<compile_context>
chip_gen: v7x
topology: tpu7x:2x2x1
jax: 0.10.0
libtpu: 0.0.40
codegen_flags: <defaults>
</compile_context>

<pallas_src>
import jax
import jax.numpy as jnp
from jax.experimental import pallas as pl
from jax.experimental.pallas import tpu as pltpu


def _round_up(v, m):
    return ((v + m - 1) // m) * m


def _pick_tm(N):
    """Row-tile size: as large as possible (up to 512); when there are >= 2 row
    tiles, prefer an even count so the v7x megacore shards the "parallel" row
    axis evenly across both TensorCores."""
    full = _round_up(N, 16)             # bf16 sublane packing: multiple of 16
    for tm in (512, 256, 128):
        if tm > full:
            continue
        n_tiles = _round_up(N, tm) // tm
        if n_tiles >= 2 and n_tiles % 2 == 0:
            return tm
    return min(512, full)


def _plan(N, tm=None, tk=None):
    if tm is None:
        tm = _pick_tm(N)
    if tk is None:
        tk = min(512, _round_up(N, 128))
    return tm, tk, _round_up(N, tm), _round_up(N, tk)


def prepare_adj(adj, *, stream_dtype=jnp.bfloat16, tm=None, tk=None):
    """Pad + cast the (static) adjacency ONCE, outside the per-call path.

    The padded bf16 copy can be cached by the caller and reused across
    layers / training steps; graph_conv() recognises it by shape+dtype and
    skips the wrapper-side O(N^2) pad/cast traffic."""
    N = adj.shape[0]
    assert adj.shape == (N, N)
    _, _, np_r, np_c = _plan(N, tm, tk)
    if adj.shape == (np_r, np_c) and adj.dtype == jnp.dtype(stream_dtype):
        return adj
    return jnp.zeros((np_r, np_c), stream_dtype).at[:N, :N].set(
        adj.astype(stream_dtype))


# ---------------- Stage 1: xw = x @ W.T (small, row-tiled) -------------------
def _xw_kernel(x_ref, wt_ref, o_ref):
    o_ref[...] = jnp.dot(x_ref[...], wt_ref[...],
                         preferred_element_type=jnp.float32).astype(o_ref.dtype)


# ---------------- Stage 2: out = adj @ xw ------------------------------------
def _adj_xw_stream_kernel(adj_ref, xw_ref, o_ref):
    # adj tile (tm, tk), xw K-slab (tk, dp); o_ref's block index is constant
    # over the K axis, so it stays VMEM-resident: accumulate in place.
    @pl.when(pl.program_id(1) == 0)
    def _():
        o_ref[...] = jnp.zeros_like(o_ref)

    o_ref[...] += jnp.dot(adj_ref[...], xw_ref[...],
                          preferred_element_type=jnp.float32)


def _make_adj_xw_resident_kernel(tk):
    # xw_ref is the full (np_c, dp) operand with a constant block index:
    # loaded into VMEM exactly once for the whole grid. Slice the current
    # K-slab out of it; adj stays K-tiled and streamed from HBM.
    def kernel(adj_ref, xw_ref, o_ref):
        k = pl.program_id(1)

        @pl.when(k == 0)
        def _():
            o_ref[...] = jnp.zeros_like(o_ref)

        start = pl.multiple_of(k * tk, tk)
        o_ref[...] += jnp.dot(adj_ref[...], xw_ref[pl.ds(start, tk), :],
                              preferred_element_type=jnp.float32)
    return kernel


def _adj_block_spec(tm, tk):
    idx = lambda i, k: (i, k)
    try:
        # Deeper buffering on the dominant (HBM-bandwidth-bound) adj stream.
        return pl.BlockSpec((tm, tk), idx, pipeline_mode=pl.Buffered(3))
    except (AttributeError, TypeError):
        return pl.BlockSpec((tm, tk), idx)


def graph_conv(adj, x, weight, *, activation=None, tm=None, tk=None,
               stream_dtype=jnp.bfloat16,
               resident_budget_bytes=12 * 1024 * 1024):
    """GraphConv forward: out = (adj @ x) @ W.T  (drop=0.0 identity, bias=False).

    adj:    (N, N) raw, or the output of prepare_adj() (padded, stream_dtype)
    x:      (N, in_dim)
    weight: (out_dim, in_dim)   (PyTorch nn.Linear layout)

    stream_dtype=jnp.float32 is the full-precision escape hatch for very large
    or poorly-scaled graphs (bf16 streaming + f32 accumulation is the default).
    """
    N, in_dim = x.shape
    out_dim = weight.shape[0]
    f32 = jnp.float32

    tm, tk, np_r, np_c = _plan(N, tm, tk)
    dp = _round_up(out_dim, 128)               # lane-dense padded output width
    itemsize = jnp.dtype(stream_dtype).itemsize

    # ---- adjacency: reuse a pre-prepared padded/cast copy when given --------
    if adj.shape == (np_r, np_c) and adj.dtype == jnp.dtype(stream_dtype):
        adj_p = adj                            # prepare_adj() output: zero-copy
    else:
        assert adj.shape == (N, N), "adj must be (N, N) or prepare_adj() output"
        adj_p = jnp.zeros((np_r, np_c), stream_dtype).at[:N, :N].set(
            adj.astype(stream_dtype))

    # ---- Stage 1: xw = x @ W.T, padded to (np_c, dp), emitted in stream_dtype
    wt = jnp.zeros((in_dim, dp), f32).at[:, :out_dim].set(weight.T.astype(f32))
    x_p = jnp.zeros((np_c, in_dim), f32).at[:N, :].set(x.astype(f32))
    t_rows = tk                                 # np_c % tk == 0 by construction
    xw = pl.pallas_call(
        _xw_kernel,
        out_shape=jax.ShapeDtypeStruct((np_c, dp), stream_dtype),
        grid_spec=pltpu.PrefetchScalarGridSpec(
            num_scalar_prefetch=0,
            grid=(np_c // t_rows,),
            in_specs=[pl.BlockSpec((t_rows, in_dim), lambda i: (i, 0)),
                      pl.BlockSpec((in_dim, dp), lambda i: (0, 0))],
            out_specs=pl.BlockSpec((t_rows, dp), lambda i: (i, 0)),
        ),
        compiler_params=pltpu.CompilerParams(
            dimension_semantics=("parallel",)),
    )(x_p, wt)

    # ---- Stage 2: out = adj_p @ xw (bf16 streamed, f32 accumulate) ----------
    xw_bytes = np_c * dp * itemsize
    resident = xw_bytes <= resident_budget_bytes
    if resident:
        # Full xw held in VMEM for the whole grid (constant block index).
        xw_spec = pl.BlockSpec((np_c, dp), lambda i, k: (0, 0))
        kernel = _make_adj_xw_resident_kernel(tk)
        xw_traffic = xw_bytes
    else:
        # Fallback: K-slab streaming (re-read once per row tile).
        xw_spec = pl.BlockSpec((tk, dp), lambda i, k: (k, 0))
        kernel = _adj_xw_stream_kernel
        xw_traffic = (np_r // tm) * np_c * dp * itemsize

    cost = pl.CostEstimate(
        flops=2 * np_r * np_c * dp,
        transcendentals=0,
        bytes_accessed=(np_r * np_c * itemsize      # adj stream
                        + xw_traffic                # xw (resident: once)
                        + np_r * dp * 4))           # f32 output writeback

    out_p = pl.pallas_call(
        kernel,
        out_shape=jax.ShapeDtypeStruct((np_r, dp), f32),
        grid_spec=pltpu.PrefetchScalarGridSpec(
            num_scalar_prefetch=0,
            grid=(np_r // tm, np_c // tk),
            in_specs=[_adj_block_spec(tm, tk), xw_spec],
            out_specs=pl.BlockSpec((tm, dp), lambda i, k: (i, 0)),
        ),
        compiler_params=pltpu.CompilerParams(
            dimension_semantics=("parallel", "arbitrary")),
        cost_estimate=cost,
    )(adj_p, xw)

    out = out_p[:N, :out_dim]
    # drop=0.0 -> dropout is identity; bias=False.
    if activation is not None:
        out = activation(out)
    return out


def xavier_uniform(key, out_dim, in_dim, dtype=jnp.float32):
    # Matches nn.init.xavier_uniform_ for a (out_dim, in_dim) Linear weight.
    bound = (6.0 / (in_dim + out_dim)) ** 0.5
    return jax.random.uniform(key, (out_dim, in_dim), dtype,
                              minval=-bound, maxval=bound)


if __name__ == "__main__":
    N, in_dim, out_dim = 128, 32, 16

    key = jax.random.PRNGKey(0)
    k_adj, k_x, k_w = jax.random.split(key, 3)

    # Synthetic symmetric normalized-ish adjacency (dense) and node features.
    adj = jax.random.uniform(k_adj, (N, N), jnp.float32)
    adj = (adj + adj.T) * 0.5 / N
    x = jax.random.normal(k_x, (N, in_dim), jnp.float32)
    weight = xavier_uniform(k_w, out_dim, in_dim)  # nn.Linear(in_dim, out_dim).weight

    # Hoist the adjacency pad+cast out of the per-call path (adj is static
    # across layers / steps) and run the resident-xw fast path.
    adj_prep = prepare_adj(adj)
    out = jax.block_until_ready(graph_conv(adj_prep, x, weight))

    # Reference check against plain JAX f32 (same math as the torch forward).
    ref = (adj @ x) @ weight.T
    assert out.shape == (N, out_dim)
    # Streamed operands are bf16 (f32 accumulation) -> loosened tolerance.
    assert jnp.allclose(out, ref, atol=1e-2, rtol=1e-2), "mismatch (resident path)"

    # Also exercise the K-slab streaming fallback path (forced) with raw adj.
    out2 = jax.block_until_ready(
        graph_conv(adj, x, weight, resident_budget_bytes=0))
    assert jnp.allclose(out2, ref, atol=1e-2, rtol=1e-2), "mismatch (stream path)"

    print("KERNEL_OK")
</pallas_src>

<mosaic_0001>
module attributes {stable_mosaic.version = 11 : i64} {
  func.func @_xw_kernel(%arg0: i32, %arg1: memref<128x32xf32, #tpu.memory_space<vmem>>, %arg2: memref<32x128xf32, #tpu.memory_space<vmem>>, %arg3: memref<128x128xbf16, #tpu.memory_space<vmem>>) attributes {dimension_semantics = [#tpu.dimension_semantics<parallel>], iteration_bounds = array<i64: 1>, scalar_prefetch = 0 : i64, scratch_operands = 0 : i64, tpu.core_type = #tpu.core_type<tc>, window_params = [{transform_indices = @transform_0, window_bounds = array<i64: 128, 32>}, {pipeline_mode = #tpu.pipeline_mode<synchronous>, transform_indices = @transform_1, window_bounds = array<i64: 32, 128>}, {transform_indices = @transform_2, window_bounds = array<i64: 128, 128>}]} {
    %c0 = arith.constant 0 : index
    %c0_0 = arith.constant 0 : index
    %0 = vector.load %arg1[%c0, %c0_0] : memref<128x32xf32, #tpu.memory_space<vmem>>, vector<128x32xf32>
    %c0_1 = arith.constant 0 : index
    %c0_2 = arith.constant 0 : index
    %1 = vector.load %arg2[%c0_1, %c0_2] : memref<32x128xf32, #tpu.memory_space<vmem>>, vector<32x128xf32>
    %cst = arith.constant dense<0.000000e+00> : vector<128x128xf32>
    %2 = tpu.matmul %0, %1, %cst {dimension_numbers = #tpu.dot_dimension_numbers<[1], [0], [0], [1], [0, 0, 1, 1], [], []>} : vector<128x32xf32>, vector<32x128xf32>, vector<128x128xf32> -> vector<128x128xf32>
    %3 = arith.truncf %2 : vector<128x128xf32> to vector<128x128xbf16>
    %c0_3 = arith.constant 0 : index
    %c0_4 = arith.constant 0 : index
    %4 = vector.load %arg3[%c0_3, %c0_4] : memref<128x128xbf16, #tpu.memory_space<vmem>>, vector<128x128xbf16>
    tpu.vector_store %arg3[%c0_3, %c0_4], %3 {strides = array<i32>} : memref<128x128xbf16, #tpu.memory_space<vmem>>, vector<128x128xbf16>,
    return
  }
  func.func @transform_0(%arg0: i32) -> (i32, i32) {
    %c0_i32 = arith.constant 0 : i32
    %c0_i32_0 = arith.constant 0 : i32
    return %arg0, %c0_i32 : i32, i32
  }
  func.func @transform_1(%arg0: i32) -> (i32, i32) {
    %c0_i32 = arith.constant 0 : i32
    %c0_i32_0 = arith.constant 0 : i32
    %c0_i32_1 = arith.constant 0 : i32
    return %c0_i32, %c0_i32_0 : i32, i32
  }
  func.func @transform_2(%arg0: i32) -> (i32, i32) {
    %c0_i32 = arith.constant 0 : i32
    %c0_i32_0 = arith.constant 0 : i32
    return %arg0, %c0_i32 : i32, i32
  }
}

</mosaic_0001>

<bundles_post_ra>
// kernel: tpu_custom_call.1
= control target key start
LH: loop header
LB: loop body
LE: loop exit
PB: predicated region body
PF: predicated region fallthrough
CT: control target
= control target key end

     0   :  { %vm32_vm0 = vcmask 261120   ;;  %s614_s0 = inlined_call_operand.vmem [shape: f32[128,32], index: 0, kind: input, shape index: {}]   ;;  %s615_s1 = inlined_call_operand.vmem [shape: f32[32,128], index: 1, kind: input, shape index: {}]   ;;  %s616_s2 = inlined_call_operand.hbm [shape: bf16[128,128], index: 2, kind: output, shape index: {}]  }
   0x1   :  { %v28_v0 = vld [vmem:[%s615_s1] sm:$0xff]  ;;  %v29_v1 = vld [vmem:[%s615_s1 + $0x8] sm:$0xff]  ;;  %v30_v2 = vld [vmem:[%s615_s1 + $0x10] sm:$0xff] }
   0x2   :  { %v469_v3 = vpack.c.bf16 %v29_v1, %v28_v0  ;;  %v31_v4 = vld [vmem:[%s615_s1 + $0x18] sm:$0xff]  ;;  %v12_v5 = vld [vmem:[%s614_s0] sm:$0xff] }
   0x3   :  { %v20_v6 = vld [vmem:[%s614_s0 + $0x40] sm:$0xff]  ;;  %v473_v7 = vpack.c.bf16 %v31_v4, %v30_v2  ;;  %445 = vmatprep.mubr.msk.f32.mxu0 %vm32_vm0, %v12_v5 }
   0x4   :  { %457 = vmatprep.mubr.msk.f32.mxu1 %vm32_vm0, %v20_v6  ;;  %470 = vmatprep.subr.bf16.mxu0 %v469_v3 }
   0x5   :  { %477 = vmatprep.subr.bf16.mxu1 %v469_v3  ;;  %472 = vmatpush3.bf16.msra.mxu0 %v469_v3 }
   0x6   :  { %479 = vmatpush3.bf16.msra.mxu1 %v469_v3  ;;  %474 = vmatprep.subr.bf16.mxu0 %v473_v7 }
   0x7   :  { %478 = vmatprep.subr.bf16.mxu1 %v473_v7 }
   0x8   :  { %7 = vsyncpa [#allocation3], 0  ;;  %v13_v8 = vld [vmem:[%s614_s0 + $0x8] sm:$0xff]  ;;  %v14_v10 = vld [vmem:[%s614_s0 + $0x10] sm:$0xff] }
   0x9   :  { %476 = vmatpush3.bf16.msra.mxu0 %v473_v7  ;;  %v21_v9 = vld [vmem:[%s614_s0 + $0x48] sm:$0xff]  ;;  %v22_v11 = vld [vmem:[%s614_s0 + $0x50] sm:$0xff]  ;;  %v15_v12 = vld [vmem:[%s614_s0 + $0x18] sm:$0xff] }
   0xa   :  { %480 = vmatpush3.bf16.msra.mxu1 %v473_v7  ;;  %v23_v13 = vld [vmem:[%s614_s0 + $0x58] sm:$0xff]  ;;  %v16_v14 = vld [vmem:[%s614_s0 + $0x20] sm:$0xff]  ;;  %v17_v16 = vld [vmem:[%s614_s0 + $0x28] sm:$0xff] }
   0xb   :  { %v24_v15 = vld [vmem:[%s614_s0 + $0x60] sm:$0xff]  ;;  %v25_v17 = vld [vmem:[%s614_s0 + $0x68] sm:$0xff]  ;;  %v18_v18 = vld [vmem:[%s614_s0 + $0x30] sm:$0xff] }
   0xc   :  { %446 = vmatmul.mubr.msk.f32.vlgmr.msra.gmra.mrb[0].mxu0 %vm32_vm0, %v13_v8  ;;  %v26_v19 = vld [vmem:[%s614_s0 + $0x70] sm:$0xff]  ;;  %v19_v20 = vld [vmem:[%s614_s0 + $0x38] sm:$0xff] }
   0xd   :  { %458 = vmatmul.mubr.msk.f32.vlgmr.msra.gmra.mrb[0].mxu1 %vm32_vm0, %v21_v9  ;;  %448 = vmatprep.mubr.msk.f32.mxu0 %vm32_vm0, %v14_v10  ;;  %v27_v21 = vld [vmem:[%s614_s0 + $0x78] sm:$0xff]  ;;  %s508_s0 = smov [#allocation2]  }
   0xe   :  { %460 = vmatprep.mubr.msk.f32.mxu1 %vm32_vm0, %v22_v11  ;;  %s311_s20 = sshll.u32 %s508_s0, 4  ;;  %s312_s20 = int_to_ptr.vmem [resolvable:$true] %s311_s20 }
   0xf   :  { %s484_s1 = scalar_lea.vmem %s312_s20, 1024  ;;  %p489_p1 = scmp.lt.s32.totalorder %s312_s20, %s312_s20 }
  0x10   :  { %449 = vmatmul.mubr.msk.f32.gmra.mrb[2].mxu0 %vm32_vm0, %v15_v12  ;;  %p485_p0 = scmp.ne.s32.totalorder %s312_s20, %s484_s1  ;;  %p490_p2 = scmp.lt.s32.totalorder %s484_s1, %s484_s1 }
  0x11   :  { %461 = vmatmul.mubr.msk.f32.gmra.mrb[2].mxu1 %vm32_vm0, %v23_v13  ;;  %451 = vmatprep.mubr.msk.f32.mxu0 %vm32_vm0, %v16_v14 }
  0x12   :  { %463 = vmatprep.mubr.msk.f32.mxu1 %vm32_vm0, %v24_v15  ;;  %p491_p3 = por %p490_p2, %p489_p1 }
  0x14   :  { %452 = vmatmul.mubr.msk.f32.gmra.mrb[4].mxu0 %vm32_vm0, %v17_v16  ;;  %p492_p4 = pnand %p491_p3, %p485_p0 }
  0x15   :  { %464 = vmatmul.mubr.msk.f32.gmra.mrb[4].mxu1 %vm32_vm0, %v25_v17  ;;  %454 = vmatprep.mubr.msk.f32.mxu0 %vm32_vm0, %v18_v18 }
  0x16   :  { %466 = vmatprep.mubr.msk.f32.mxu1 %vm32_vm0, %v26_v19 }
  0x18   :  { %455 = vmatmul.mubr.msk.f32.gmra.mrb[6].mxu0 %vm32_vm0, %v19_v20 }
  0x19   :  { %467 = vmatmul.mubr.msk.f32.gmra.mrb[6].mxu1 %vm32_vm0, %v27_v21 }
  0xdf   :  { %v447_v22 = vpop.f32.mrb[0].mxu0 }
  0xe0   :  { %v459_v23 = vpop.f32.mrb[0].mxu1  ;;  %v147_v24 = vpop.f32.mrb[1].mxu0 }
  0xe1   :  { %v187_v25 = vpop.f32.mrb[1].mxu1  ;;  %v373_v26 = vpack.c.bf16 %v447_v22, %v147_v24 }
  0xe2   :  { %v393_v27 = vpack.c.bf16 %v459_v23, %v187_v25 }
  0xe3   :  { %374 = vst [vmem:[#allocation2] sm:$0xff] %v373_v26   ;;  %v450_v28 = vpop.f32.mrb[2].mxu0 }
  0xe4   :  { %413 = vst [vmem:[#allocation2 + $0x20] sm:$0xff] %v393_v27   ;;  %v462_v29 = vpop.f32.mrb[2].mxu1  ;;  %v157_v30 = vpop.f32.mrb[3].mxu0 }
  0xe5   :  { %v197_v31 = vpop.f32.mrb[3].mxu1  ;;  %v378_v32 = vpack.c.bf16 %v450_v28, %v157_v30 }
  0xe6   :  { %v398_v33 = vpack.c.bf16 %v462_v29, %v197_v31 }
  0xe7   :  { %410 = vst [vmem:[#allocation2 + $0x8] sm:$0xff] %v378_v32   ;;  %v453_v34 = vpop.f32.mrb[4].mxu0 }
  0xe8   :  { %414 = vst [vmem:[#allocation2 + $0x28] sm:$0xff] %v398_v33   ;;  %v465_v35 = vpop.f32.mrb[4].mxu1  ;;  %v167_v36 = vpop.f32.mrb[5].mxu0 }
  0xe9   :  { %v207_v37 = vpop.f32.mrb[5].mxu1  ;;  %v383_v38 = vpack.c.bf16 %v453_v34, %v167_v36 }
  0xea   :  { %v403_v39 = vpack.c.bf16 %v465_v35, %v207_v37 }
  0xeb   :  { %411 = vst [vmem:[#allocation2 + $0x10] sm:$0xff] %v383_v38   ;;  %v456_v40 = vpop.f32.mrb[6].mxu0 }
  0xec   :  { %415 = vst [vmem:[#allocation2 + $0x30] sm:$0xff] %v403_v39   ;;  %v468_v41 = vpop.f32.mrb[6].mxu1  ;;  %v177_v42 = vpop.f32.mrb[7].mxu0 }
  0xed   :  { %v217_v43 = vpop.f32.mrb[7].mxu1  ;;  %v388_v44 = vpack.c.bf16 %v456_v40, %v177_v42 }
  0xee   :  { %v408_v45 = vpack.c.bf16 %v468_v41, %v217_v43 }
  0xef   :  { %412 = vst [vmem:[#allocation2 + $0x18] sm:$0xff] %v388_v44  }
  0xf0   :  { %416 = vst [vmem:[#allocation2 + $0x38] sm:$0xff] %v408_v45  }
  0xf1   :  { %495 = shalt.err (!%p492_p4)
}
  0xf2   :  { %s496_s23 = scalar_lea.hbm %s616_s2, 1024 }
  0xf3   :  { %p497_p5 = scmp.ne.s32.totalorder %s616_s2, %s496_s23  ;;  %p500_p6 = scmp.lt.u32.totalorder %s496_s23, %s616_s2 }
  0xf5   :  { %p502_p7 = pnand %p500_p6, %p497_p5 }
  0xf7   :  { %505 = shalt.err (!%p502_p7)
}
  0xf8   :  { %s509_s28 = smov 64   ;;  %s510_s29 = smov 4  }
  0xf9   :  { %317 = dma.vmem_to_hbm [thread:$0]  %s312_s20, 1024, %s616_s2, [#allocation3], %s509_s28, %s509_s28, %s510_s29  }
  0xfa   :  { %506 = dma.done.wait [#allocation3], 1024  }
  0xfb   :  { %507 = vsyncadd [#allocation3], 4294966272 }
  0xfc   :  { %321 = vsyncpa [#allocation3], 1 }

</bundles_post_ra>
